<compile_context>
chip_gen: v5e
topology: v5e:2x2
jax: 0.10.0
libtpu: 0.0.40
codegen_flags: <defaults>
</compile_context>

<pallas_src>
from typing import Dict, List, Tuple

import jax
import jax.numpy as jnp
from jax.experimental import pallas as pl
from jax.experimental.pallas import tpu as pltpu


# ----------------------------------------------------------------------------
# One-time parameter preparation (hoisted out of the forward pass)
# ----------------------------------------------------------------------------

def _rup(x: int, m: int) -> int:
    return ((x + m - 1) // m) * m


def _block_diag(blocks):
    rows = sum(b.shape[0] for b in blocks)
    cols = sum(b.shape[1] for b in blocks)
    out = jnp.zeros((rows, cols), jnp.float32)
    r = c = 0
    for b in blocks:
        out = out.at[r:r + b.shape[0], c:c + b.shape[1]].set(b.astype(jnp.float32))
        r += b.shape[0]
        c += b.shape[1]
    return out


def prepare_params(functions: List[str],
                   weights: List[jax.Array],
                   biases: List[jax.Array]) -> Tuple[jax.Array, dict]:
    """Pack all per-function MLP parameters into ONE aligned f32 slab.

    weights[i] : (F, in_i, out_i),  biases[i] : (F, 1, out_i)

    Returns (slab, meta) where slab is a (R, C) f32 array (R % 8 == 0,
    C % 128 == 0) and meta holds static row offsets / logical shapes.
    Everything is stored in the "transposed" layout the kernel uses
    (h carried as (F*H, N) with N on lanes):
        layer 0      : w0 column (F*H1, 1), b0 column (F*H1, 1)
        hidden i     : block-diag W_i^T (F*H_out, F*H_in), b_i column
        last layer   : block-diag W_L^T rows (F, F*H_last), b_L column (F, 1)
    """
    F = len(functions)
    L = len(weights)
    pieces: List[jax.Array] = []

    if L == 1:
        # Single Linear(1, 1) per function.
        pieces.append(jnp.reshape(weights[0].astype(jnp.float32), (F, 1)))
        pieces.append(jnp.reshape(biases[0].astype(jnp.float32), (F, 1)))
    else:
        H1 = weights[0].shape[2]
        pieces.append(jnp.reshape(weights[0].astype(jnp.float32), (F * H1, 1)))
        pieces.append(jnp.reshape(biases[0].astype(jnp.float32), (F * H1, 1)))
        for i in range(1, L - 1):
            w = weights[i]                              # (F, Hin, Hout)
            h_out = w.shape[2]
            pieces.append(_block_diag([w[f].T for f in range(F)]))
            pieces.append(jnp.reshape(biases[i].astype(jnp.float32),
                                      (F * h_out, 1)))
        wl = weights[L - 1]                             # (F, Hlast, 1)
        pieces.append(_block_diag([wl[f].T for f in range(F)]))   # (F, F*Hlast)
        pieces.append(jnp.reshape(biases[L - 1].astype(jnp.float32), (F, 1)))

    C = _rup(max(p.shape[1] for p in pieces), 128)
    padded, piece_meta = [], []
    off = 0
    for p in pieces:
        r, c = p.shape
        rp = _rup(r, 8)
        padded.append(jnp.pad(p, ((0, rp - r), (0, C - c))))
        piece_meta.append((off, r, rp, c))
        off += rp
    slab = jnp.concatenate(padded, axis=0)

    meta = dict(F=F, L=L, pieces=tuple(piece_meta), functions=tuple(functions))
    return slab, meta


# ----------------------------------------------------------------------------
# Fused kernel (all functions, all layers, one invocation per N-tile)
# ----------------------------------------------------------------------------

def _make_kernel(meta: dict):
    F, L = meta["F"], meta["L"]
    pieces = meta["pieces"]

    def load(slab_ref, idx, padded_rows=False):
        off, r, rp, c = pieces[idx]
        rr = rp if padded_rows else r
        return slab_ref[off:off + rr, 0:c]

    # TODO(synk): activation_function is hard-coded to tanh (the common choice
    # for this module); other callables would need a matching jnp op here.
    def kernel(t_ref, slab_ref, out_ref):
        t_row = t_ref[...].astype(jnp.float32)              # (1, TN)

        if L == 1:
            w = load(slab_ref, 0)                            # (F, 1)
            b = load(slab_ref, 1)                            # (F, 1)
            out_ref[...] = (w * t_row + b).astype(out_ref.dtype)
            return

        # First layer (in_dim = 1): outer product via VPU broadcast, no MXU.
        w0 = load(slab_ref, 0)                               # (F*H1, 1)
        b0 = load(slab_ref, 1)                               # (F*H1, 1)
        h = jnp.tanh(w0 * t_row + b0)                        # (F*H1, TN)

        # Hidden layers: one block-diagonal 2-D MXU dot for all F functions.
        for i in range(1, L - 1):
            w = load(slab_ref, 2 * i)                        # (F*Hout, F*Hin)
            b = load(slab_ref, 2 * i + 1)                    # (F*Hout, 1)
            h = jnp.tanh(
                jnp.dot(w, h, preferred_element_type=jnp.float32) + b)

        # Last layer (out_dim = 1 per function): small block-diag dot.  Rows
        # are loaded 8-padded (zero rows) so the MXU sees an aligned M.
        wl = load(slab_ref, 2 * (L - 1), padded_rows=True)   # (rup8(F), F*Hl)
        bl = load(slab_ref, 2 * (L - 1) + 1, padded_rows=True)  # (rup8(F), 1)
        out = jnp.dot(wl, h, preferred_element_type=jnp.float32) + bl
        out_ref[...] = out[0:F, :].astype(out_ref.dtype)     # (F, TN)

    return kernel


def _choose_n_tile(N: int) -> int:
    # Tile large, 128-aligned N so the second TensorCore can be used (v7x) and
    # per-step activations stay tiny; otherwise run the whole N in one step.
    if N >= 256 and N % 128 == 0:
        for cand in (512, 256, 128):
            if N % cand == 0:
                return cand
    return N


# ----------------------------------------------------------------------------
# Forward pass
# ----------------------------------------------------------------------------

def equations_model_forward(t: jax.Array, slab: jax.Array,
                            meta: dict) -> Dict[str, jax.Array]:
    """Forward pass. t: (N, 1) (or (N,)) float; returns {name: (N, 1)}."""
    functions = meta["functions"]
    F = meta["F"]
    N = int(t.reshape(-1).shape[0])
    t_row = jnp.reshape(t.astype(jnp.float32), (1, N))       # free reshape

    TN = _choose_n_tile(N)
    num_tiles = N // TN
    R, C = slab.shape

    stacked = pl.pallas_call(
        _make_kernel(meta),
        out_shape=jax.ShapeDtypeStruct((F, N), jnp.float32),
        grid=(num_tiles,),
        in_specs=[
            pl.BlockSpec((1, TN), lambda i: (0, i)),          # t tile
            pl.BlockSpec((R, C), lambda i: (0, 0)),           # param slab (resident)
        ],
        out_specs=pl.BlockSpec((F, TN), lambda i: (0, i)),    # lane-dense (F, TN)
        compiler_params=pltpu.CompilerParams(
            dimension_semantics=("parallel",)),
    )(t_row, slab)

    return {fn: stacked[i].reshape(N, 1) for i, fn in enumerate(functions)}


# ----------------------------------------------------------------------------
# Synthetic init + plain-JAX reference
# ----------------------------------------------------------------------------

def init_params(key, functions: List[str], features: List[int]):
    """Deterministic synthetic parameter init (stacked over functions)."""
    F = len(functions)
    dims = [1] + list(features) + [1]
    weights, biases = [], []
    for i in range(len(dims) - 1):
        key, kw, kb = jax.random.split(key, 3)
        scale = 1.0 / jnp.sqrt(jnp.float32(dims[i]))
        w = jax.random.uniform(kw, (F, dims[i], dims[i + 1]),
                               jnp.float32, -scale, scale)
        b = jax.random.uniform(kb, (F, 1, dims[i + 1]),
                               jnp.float32, -scale, scale)
        weights.append(w)
        biases.append(b)
    return weights, biases


def _reference_forward(t, functions, weights, biases):
    """Plain-JAX reference for correctness checking."""
    out = {}
    n_layers = len(weights)
    for i, fn in enumerate(functions):
        h = t
        for li in range(n_layers):
            h = h @ weights[li][i] + biases[li][i]
            if li < n_layers - 1:
                h = jnp.tanh(h)
        out[fn] = h
    return out


if __name__ == "__main__":
    key = jax.random.PRNGKey(0)

    # ---- Test 1: canonical toy config (F=2, features=[32,32], N=8) ----------
    functions = ["x", "y"]
    features = [32, 32]
    N = 8
    key, kt = jax.random.split(key)
    t = jax.random.normal(kt, (N, 1), jnp.float32)
    weights, biases = init_params(key, functions, features)

    slab, meta = prepare_params(functions, weights, biases)   # one-time prep
    out = equations_model_forward(t, slab, meta)
    jax.block_until_ready(out)

    ref = _reference_forward(t, functions, weights, biases)
    for fn in functions:
        assert out[fn].shape == (N, 1)
        assert jnp.allclose(out[fn], ref[fn], atol=1e-5, rtol=1e-5)

    # ---- Test 2: larger N exercising the tiled (grid over N) path -----------
    N2 = 1024
    key, kt2 = jax.random.split(key)
    t2 = jax.random.normal(kt2, (N2, 1), jnp.float32)
    out2 = equations_model_forward(t2, slab, meta)
    jax.block_until_ready(out2)
    ref2 = _reference_forward(t2, functions, weights, biases)
    for fn in functions:
        assert out2[fn].shape == (N2, 1)
        assert jnp.allclose(out2[fn], ref2[fn], atol=1e-5, rtol=1e-5)

    # ---- Test 3: degenerate no-hidden-layer model (Linear(1,1) per fn) ------
    w1, b1 = init_params(jax.random.PRNGKey(1), functions, [])
    slab1, meta1 = prepare_params(functions, w1, b1)
    out3 = equations_model_forward(t, slab1, meta1)
    jax.block_until_ready(out3)
    ref3 = _reference_forward(t, functions, w1, b1)
    for fn in functions:
        assert jnp.allclose(out3[fn], ref3[fn], atol=1e-5, rtol=1e-5)

    print("KERNEL_OK")
</pallas_src>

<mosaic_0001>
module attributes {stable_mosaic.version = 11 : i64} {
  func.func @kernel(%arg0: i32, %arg1: memref<1x8xf32, #tpu.memory_space<vmem>>, %arg2: memref<272x128xf32, #tpu.memory_space<vmem>>, %arg3: memref<2x8xf32, #tpu.memory_space<vmem>>) attributes {dimension_semantics = [#tpu.dimension_semantics<parallel>], iteration_bounds = array<i64: 1>, scalar_prefetch = 0 : i64, scratch_operands = 0 : i64, tpu.core_type = #tpu.core_type<tc>, window_params = [{transform_indices = @transform_0, window_bounds = array<i64: 1, 8>}, {pipeline_mode = #tpu.pipeline_mode<synchronous>, transform_indices = @transform_1, window_bounds = array<i64: 272, 128>}, {transform_indices = @transform_2, window_bounds = array<i64: 2, 8>}]} {
    %c0 = arith.constant 0 : index
    %c0_0 = arith.constant 0 : index
    %0 = vector.load %arg1[%c0, %c0_0] : memref<1x8xf32, #tpu.memory_space<vmem>>, vector<1x8xf32>
    %c0_1 = arith.constant 0 : index
    %c0_2 = arith.constant 0 : index
    %1 = vector.load %arg2[%c0_1, %c0_2] : memref<272x128xf32, #tpu.memory_space<vmem>>, vector<64x1xf32>
    %c64 = arith.constant 64 : index
    %c0_3 = arith.constant 0 : index
    %2 = vector.load %arg2[%c64, %c0_3] : memref<272x128xf32, #tpu.memory_space<vmem>>, vector<64x1xf32>
    %3 = vector.broadcast %1 : vector<64x1xf32> to vector<64x8xf32>
    %4 = vector.broadcast %0 : vector<1x8xf32> to vector<64x8xf32>
    %5 = arith.mulf %3, %4 : vector<64x8xf32>
    %6 = vector.broadcast %2 : vector<64x1xf32> to vector<64x8xf32>
    %7 = arith.addf %5, %6 : vector<64x8xf32>
    %8 = math.tanh %7 : vector<64x8xf32>
    %c128 = arith.constant 128 : index
    %c0_4 = arith.constant 0 : index
    %9 = vector.load %arg2[%c128, %c0_4] : memref<272x128xf32, #tpu.memory_space<vmem>>, vector<64x64xf32>
    %c192 = arith.constant 192 : index
    %c0_5 = arith.constant 0 : index
    %10 = vector.load %arg2[%c192, %c0_5] : memref<272x128xf32, #tpu.memory_space<vmem>>, vector<64x1xf32>
    %cst = arith.constant dense<0.000000e+00> : vector<64x8xf32>
    %11 = tpu.matmul %9, %8, %cst {dimension_numbers = #tpu.dot_dimension_numbers<[1], [0], [0], [1], [0, 0, 1, 1], [], []>} : vector<64x64xf32>, vector<64x8xf32>, vector<64x8xf32> -> vector<64x8xf32>
    %12 = vector.broadcast %10 : vector<64x1xf32> to vector<64x8xf32>
    %13 = arith.addf %11, %12 : vector<64x8xf32>
    %14 = math.tanh %13 : vector<64x8xf32>
    %c256 = arith.constant 256 : index
    %c0_6 = arith.constant 0 : index
    %15 = vector.load %arg2[%c256, %c0_6] : memref<272x128xf32, #tpu.memory_space<vmem>>, vector<8x64xf32>
    %c264 = arith.constant 264 : index
    %c0_7 = arith.constant 0 : index
    %16 = vector.load %arg2[%c264, %c0_7] : memref<272x128xf32, #tpu.memory_space<vmem>>, vector<8x1xf32>
    %cst_8 = arith.constant dense<0.000000e+00> : vector<8x8xf32>
    %17 = tpu.matmul %15, %14, %cst_8 {dimension_numbers = #tpu.dot_dimension_numbers<[1], [0], [0], [1], [0, 0, 1, 1], [], []>} : vector<8x64xf32>, vector<64x8xf32>, vector<8x8xf32> -> vector<8x8xf32>
    %18 = vector.broadcast %16 : vector<8x1xf32> to vector<8x8xf32>
    %19 = arith.addf %17, %18 : vector<8x8xf32>
    %20 = vector.extract_strided_slice %19 {offsets = [0, 0], sizes = [2, 8], strides = [1, 1]} : vector<8x8xf32> to vector<2x8xf32>
    %c0_9 = arith.constant 0 : index
    %c0_10 = arith.constant 0 : index
    %21 = vector.load %arg3[%c0_9, %c0_10] : memref<2x8xf32, #tpu.memory_space<vmem>>, vector<2x8xf32>
    tpu.vector_store %arg3[%c0_9, %c0_10], %20 {strides = array<i32>} : memref<2x8xf32, #tpu.memory_space<vmem>>, vector<2x8xf32>,
    return
  }
  func.func @transform_0(%arg0: i32) -> (i32, i32) {
    %c0_i32 = arith.constant 0 : i32
    %c0_i32_0 = arith.constant 0 : i32
    return %c0_i32, %arg0 : i32, i32
  }
  func.func @transform_1(%arg0: i32) -> (i32, i32) {
    %c0_i32 = arith.constant 0 : i32
    %c0_i32_0 = arith.constant 0 : i32
    %c0_i32_1 = arith.constant 0 : i32
    return %c0_i32, %c0_i32_0 : i32, i32
  }
  func.func @transform_2(%arg0: i32) -> (i32, i32) {
    %c0_i32 = arith.constant 0 : i32
    %c0_i32_0 = arith.constant 0 : i32
    return %c0_i32, %arg0 : i32, i32
  }
}

</mosaic_0001>

<bundles_post_ra>
// kernel: tpu_custom_call.1
= control target key start
LH: loop header
LB: loop body
LE: loop exit
PB: predicated region body
PF: predicated region fallthrough
CT: control target
= control target key end

     0   :  { %7 = vsyncpa [#allocation3], 0  ;;  %s530_s0 = inlined_call_operand.hbm [shape: f32[1,8], index: 0, kind: input, shape index: {}]   ;;  %s531_s1 = inlined_call_operand.hbm [shape: f32[272,128], index: 1, kind: input, shape index: {}]   ;;  %s532_s2 = inlined_call_operand.hbm [shape: f32[2,8], index: 2, kind: output, shape index: {}]  }
   0x1   :  { %8 = vsyncpa [#allocation6], 0 }
   0x2   :  { %9 = vsyncpa [#allocation4], 0  ;;  %s15_s11 = sshll.u32 %s530_s0, 4  ;;  %s491_s12 = smov [#allocation2]   ;;  %s16_s11 = int_to_ptr.hbm [resolvable:$true] %s15_s11 }
   0x3   :  { %s17_s13 = sshll.u32 %s491_s12, 4  ;;  %s25_s16 = sshll.u32 %s531_s1, 4  ;;  %s18_s13 = int_to_ptr.vmem [resolvable:$true] %s17_s13  ;;  %s26_s16 = int_to_ptr.hbm [resolvable:$true] %s25_s16 }
   0x4   :  { %20 = dma.hbm_to_vmem [thread:$0]  %s16_s11, 16, %s18_s13, [#allocation3]  }
   0x5   :  { %s492_s17 = smov [#allocation5]   ;;  %s493_s19 = smov 128  }
   0x6   :  { %s27_s18 = sshll.u32 %s492_s17, 4  ;;  %s494_s20 = smov 8   ;;  %s28_s18 = int_to_ptr.vmem [resolvable:$true] %s27_s18 }
   0x7   :  { %33 = dma.hbm_to_vmem [thread:$0]  %s26_s16, 4352, %s28_s18, [#allocation6], %s493_s19, %s493_s19, %s494_s20  }
   0x8   :  { %485 = dma.done.wait [#allocation3], 16  }
   0x9   :  { %486 = vsyncadd [#allocation3], 4294967280 }
   0xa   :  { %487 = dma.done.wait [#allocation6], 4352  }
   0xb   :  { %488 = vsyncadd [#allocation6], 4294962944  ;;  %v495_v0 = vmov 0   ;;  %v58_v1 = vld [vmem:[#allocation5 + $0x78] sm:$0xff]  ;;  %v57_v2 = vld [vmem:[#allocation5 + $0x70] sm:$0xff]  ;;  %vm222_vm0 = vcmask 523264  }
   0xc   :  { %379 = vset.pattern.permute.xlu2 %v495_v0  ;;  %378 = vset.pattern.permute.xlu1 %v495_v0  ;;  %v50_v3 = vld [vmem:[#allocation5 + $0x38] sm:$0xff]  ;;  %v48_v4 = vld [vmem:[#allocation5 + $0x28] sm:$0xff]  ;;  %v47_v5 = vld [vmem:[#allocation5 + $0x20] sm:$0xff]  ;;  %s496_s0 = smov [#allocation7]   ;;  %s335_s23 = sshll.u32 %s532_s2, 4  ;;  %vm326_vm1 = vcmask 58368   ;;  %s336_s23 = int_to_ptr.hbm [resolvable:$true] %s335_s23 }
   0xd   :  { %377 = vset.pattern.permute.xlu0 %v495_v0  ;;  %147 = vperm.xlu1 %378, %v58_v1   ;;  %v49_v6 = vld [vmem:[#allocation5 + $0x30] sm:$0xff]  ;;  %v55_v7 = vld [vmem:[#allocation5 + $0x60] sm:$0xff]  ;;  %v46_v8 = vld [vmem:[#allocation5 + $0x18] sm:$0xff]  ;;  %s333_s1 = sshll.u32 %s496_s0, 4  ;;  %s334_s1 = int_to_ptr.vmem [resolvable:$true] %s333_s1 }
   0xe   :  { %142 = vperm.xlu2 %379, %v57_v2   ;;  %96 = vperm.xlu0 %377, %v50_v3   ;;  %v56_v9 = vld [vmem:[#allocation5 + $0x68] sm:$0xff]  ;;  %v54_v10 = vld [vmem:[#allocation5 + $0x58] sm:$0xff]  ;;  %v45_v12 = vld [vmem:[#allocation5 + $0x10] sm:$0xff] }
   0xf   :  { %v44_v11 = vld [vmem:[#allocation5 + $0x8] sm:$0xff]  ;;  %v43_v14 = vld [vmem:[#allocation5] sm:$0xff]  ;;  %v53_v15 = vld [vmem:[#allocation5 + $0x50] sm:$0xff] }
  0x10   :  { %v52_v13 = vld [vmem:[#allocation5 + $0x48] sm:$0xff]  ;;  %v180_v16 = vld [vmem:[#allocation5 + $0xf0] sm:$0xff]  ;;  %v181_v17 = vld [vmem:[#allocation5 + $0xf8] sm:$0xff] }
  0x11   :  { %v51_v18 = vld [vmem:[#allocation5 + $0x40] sm:$0xff]  ;;  %v177_v19 = vld [vmem:[#allocation5 + $0xd8] sm:$0xff]  ;;  %v179_v21 = vld [vmem:[#allocation5 + $0xe8] sm:$0xff] }
  0x12   :  { %v178_v20 = vld [vmem:[#allocation5 + $0xe0] sm:$0xff]  ;;  %v175_v23 = vld [vmem:[#allocation5 + $0xc8] sm:$0xff]  ;;  %v176_v24 = vld [vmem:[#allocation5 + $0xd0] sm:$0xff] }
  0x13   :  { %v174_v22 = vld [vmem:[#allocation5 + $0xc0] sm:$0xff]  ;;  %v297_v25 = vld [vmem:[#allocation5 + $0x108] sm:$0xff]  ;;  %v380_v27 = vld [vmem:[#allocation2] ss:$0 sm:$0xff] }
  0x14   :  { %v166_v2 = vld [vmem:[#allocation5 + $0x80] sm:$0xff] }
  0x15   :  { %86 = vperm.xlu1 %378, %v48_v4   ;;  %v168_v4 = vld [vmem:[#allocation5 + $0x90] sm:$0xff] }
  0x16   :  { %81 = vperm.xlu2 %379, %v47_v5   ;;  %91 = vperm.xlu0 %377, %v49_v6   ;;  %v171_v5 = vld [vmem:[#allocation5 + $0xa8] sm:$0xff] }
  0x17   :  { %v167_v6 = vld [vmem:[#allocation5 + $0x88] sm:$0xff] }
  0x1d   :  { %76 = vperm.xlu1 %378, %v46_v8   ;;  %v172_v8 = vld [vmem:[#allocation5 + $0xb0] sm:$0xff] }
  0x1e   :  { %132 = vperm.xlu2 %379, %v55_v7   ;;  %137 = vperm.xlu0 %377, %v56_v9   ;;  %v169_v7 = vld [vmem:[#allocation5 + $0x98] sm:$0xff]  ;;  %v170_v9 = vld [vmem:[#allocation5 + $0xa0] sm:$0xff] }
  0x25   :  { %127 = vperm.xlu1 %378, %v54_v10   ;;  %v173_v10 = vld [vmem:[#allocation5 + $0xb8] sm:$0xff] }
  0x26   :  { %66 = vperm.xlu2 %379, %v44_v11   ;;  %71 = vperm.xlu0 %377, %v45_v12  }
  0x2d   :  { %61 = vperm.xlu1 %378, %v43_v14  }
  0x2e   :  { %117 = vperm.xlu2 %379, %v52_v13   ;;  %122 = vperm.xlu0 %377, %v53_v15  }
  0x35   :  { %219 = vperm.xlu1 %378, %v181_v17  }
  0x36   :  { %214 = vperm.xlu2 %379, %v180_v16   ;;  %112 = vperm.xlu0 %377, %v51_v18  }
  0x3d   :  { %204 = vperm.xlu1 %378, %v178_v20  }
  0x3e   :  { %199 = vperm.xlu2 %379, %v177_v19   ;;  %209 = vperm.xlu0 %377, %v179_v21  }
  0x45   :  { %189 = vperm.xlu1 %378, %v175_v23  }
  0x46   :  { %184 = vperm.xlu2 %379, %v174_v22   ;;  %194 = vperm.xlu0 %377, %v176_v24  }
  0x4e   :  { %300 = vperm.xlu0 %377, %v297_v25  }
  0x68   :  { %v143_v26 = vpop.permute.xlu2 %142 }
  0x70   :  { %v82_v29 = vpop.permute.xlu2 %81 }
  0x71   :  { %v106_v39 = vmul.f32 %v380_v27, %v82_v29 }
  0x78   :  { %v133_v36 = vpop.permute.xlu2 %132 }
  0x79   :  { %v154_v43 = vadd.f32 %v133_v36, %v106_v39 }
  0x7f   :  { %v148_v28 = vpop.permute.xlu1 %147 }
  0x80   :  { %v97_v30 = vpop.permute.xlu0 %96  ;;  %v67_v46 = vpop.permute.xlu2 %66 }
  0x81   :  { %v109_v31 = vmul.f32 %v380_v27, %v97_v30  ;;  %v103_v53 = vmul.f32 %v380_v27, %v67_v46 }
  0x83   :  { %v157_v32 = vadd.f32 %v148_v28, %v109_v31 }
  0x85   :  { %381 = vtanh.f32 %v157_v32 }
  0x87   :  { %v87_v33 = vpop.permute.xlu1 %86 }
  0x88   :  { %v92_v34 = vpop.permute.xlu0 %91  ;;  %v107_v40 = vmul.f32 %v380_v27, %v87_v33  ;;  %v118_v54 = vpop.permute.xlu2 %117 }
  0x89   :  { %v108_v35 = vmul.f32 %v380_v27, %v92_v34  ;;  %v151_v58 = vadd.f32 %v118_v54, %v103_v53 }
  0x8b   :  { %v382_v37 = vpop.eup %381  ;;  %v156_v38 = vadd.f32 %v143_v26, %v108_v35 }
  0x8c   :  { %255 = vmatpush.msra.mxu0 %v382_v37  ;;  %355 = vmatpush.msra.mxu2 %v382_v37 }
  0x8d   :  { %383 = vtanh.f32 %v156_v38  ;;  %356 = vmatpush.msra.mxu3 %v382_v37 }
  0x8f   :  { %v77_v41 = vpop.permute.xlu1 %76 }
  0x90   :  { %v138_v42 = vpop.permute.xlu0 %137  ;;  %v105_v47 = vmul.f32 %v380_v27, %v77_v41  ;;  %v215_v15 = vpop.permute.xlu2 %214 }
  0x91   :  { %v155_v44 = vadd.f32 %v138_v42, %v107_v40  ;;  %v296_v42 = vld [vmem:[#allocation5 + $0x100] sm:$0xff] }
  0x93   :  { %v384_v45 = vpop.eup %383  ;;  %385 = vtanh.f32 %v155_v44 }
  0x94   :  { %256 = vmatpush.msra.mxu0 %v384_v45  ;;  %357 = vmatpush.msra.mxu2 %v384_v45  ;;  %387 = vtanh.f32 %v154_v43 }
  0x95   :  { %358 = vmatpush.msra.mxu3 %v384_v45 }
  0x97   :  { %v128_v48 = vpop.permute.xlu1 %127 }
  0x98   :  { %v153_v49 = vadd.f32 %v128_v48, %v105_v47  ;;  %v72_v50 = vpop.permute.xlu0 %71  ;;  %v200_v23 = vpop.permute.xlu2 %199 }
  0x99   :  { %v386_v51 = vpop.eup %385  ;;  %v104_v55 = vmul.f32 %v380_v27, %v72_v50 }
  0x9a   :  { %389 = vtanh.f32 %v153_v49  ;;  %257 = vmatpush.msra.mxu0 %v386_v51  ;;  %359 = vmatpush.msra.mxu2 %v386_v51  ;;  %v388_v52 = vpop.eup %387 }
  0x9b   :  { %360 = vmatpush.msra.mxu3 %v386_v51 }
  0x9c   :  { %258 = vmatpush.msra.mxu0 %v388_v52  ;;  %361 = vmatpush.msra.mxu2 %v388_v52 }
  0x9d   :  { %362 = vmatpush.msra.mxu3 %v388_v52 }
  0x9f   :  { %v62_v60 = vpop.permute.xlu1 %61 }
  0xa0   :  { %v390_v56 = vpop.eup %389  ;;  %v123_v57 = vpop.permute.xlu0 %122  ;;  %v102_v61 = vmul.f32 %v380_v27, %v62_v60 }
  0xa1   :  { %v152_v59 = vadd.f32 %v123_v57, %v104_v55  ;;  %259 = vmatpush.msra.mxu0 %v390_v56  ;;  %363 = vmatpush.msra.mxu2 %v390_v56  ;;  %v185_v35 = vpop.permute.xlu2 %184 }
  0xa2   :  { %364 = vmatpush.msra.mxu3 %v390_v56 }
  0xa3   :  { %391 = vtanh.f32 %v152_v59 }
  0xa4   :  { %393 = vtanh.f32 %v151_v58 }
  0xa7   :  { %v220_v13 = vpop.permute.xlu1 %219 }
  0xa8   :  { %v113_v62 = vpop.permute.xlu0 %112 }
  0xa9   :  { %v392_v63 = vpop.eup %391  ;;  %v150_v0 = vadd.f32 %v113_v62, %v102_v61 }
  0xaa   :  { %260 = vmatpush.msra.mxu0 %v392_v63  ;;  %365 = vmatpush.msra.mxu2 %v392_v63  ;;  %v394_v1 = vpop.eup %393 }
  0xab   :  { %395 = vtanh.f32 %v150_v0  ;;  %366 = vmatpush.msra.mxu3 %v392_v63 }
  0xac   :  { %261 = vmatpush.msra.mxu0 %v394_v1  ;;  %367 = vmatpush.msra.mxu2 %v394_v1 }
  0xad   :  { %368 = vmatpush.msra.mxu3 %v394_v1 }
  0xaf   :  { %v205_v20 = vpop.permute.xlu1 %204 }
  0xb0   :  { %v210_v17 = vpop.permute.xlu0 %209 }
  0xb1   :  { %v396_v3 = vpop.eup %395 }
  0xb2   :  { %262 = vmatpush.msra.mxu0 %v396_v3  ;;  %369 = vmatpush.msra.mxu2 %v396_v3 }
  0xb3   :  { %370 = vmatpush.msra.mxu3 %v396_v3  ;;  %346 = vmatmul.msk.f32.vlgmr.msra.gmra.mxu0 %vm222_vm0, %v166_v2 }
  0xb4   :  { %348 = vmatmul.msk.f32.vlgmr.msra.gmra.mxu2 %vm222_vm0, %v168_v4  ;;  %351 = vmatmul.msk.f32.vlgmr.msra.gmra.mxu3 %vm222_vm0, %v171_v5 }
  0xb7   :  { %v190_v32 = vpop.permute.xlu1 %189 }
  0xb8   :  { %v195_v28 = vpop.permute.xlu0 %194 }
  0xbb   :  { %347 = vmatmul.msk.f32.gmra.mxu0 %vm222_vm0, %v167_v6 }
  0xbc   :  { %349 = vmatmul.msk.f32.gmra.mxu2 %vm222_vm0, %v169_v7  ;;  %352 = vmatmul.msk.f32.gmra.mxu3 %vm222_vm0, %v172_v8 }
  0xc0   :  { %v301_v44 = vpop.permute.xlu0 %300 }
  0xc4   :  { %350 = vmatmul.msk.f32.gmra.mxu2 %vm222_vm0, %v170_v9  ;;  %353 = vmatmul.msk.f32.gmra.mxu3 %vm222_vm0, %v173_v10 }
 0x130   :  { %v264_v18 = vpop.f32.mrf.mxu0 }
 0x131   :  { %v265_v37 = vadd.f32 %v264_v18, %v185_v35 }
 0x137   :  { %v270_v11 = vpop.f32.mrf.mxu2  ;;  %v279_v12 = vpop.f32.mrf.mxu3 }
 0x138   :  { %v280_v25 = vadd.f32 %v279_v12, %v210_v17  ;;  %v267_v29 = vpop.f32.mrf.mxu0  ;;  %v271_v31 = vadd.f32 %v270_v11, %v195_v28 }
 0x139   :  { %v268_v34 = vadd.f32 %v267_v29, %v190_v32 }
 0x13f   :  { %v282_v14 = vpop.f32.mrf.mxu3  ;;  %v273_v16 = vpop.f32.mrf.mxu2 }
 0x140   :  { %v283_v22 = vadd.f32 %v282_v14, %v215_v15  ;;  %v274_v27 = vadd.f32 %v273_v16, %v200_v23 }
 0x147   :  { %v285_v19 = vpop.f32.mrf.mxu3  ;;  %v276_v24 = vpop.f32.mrf.mxu2 }
 0x148   :  { %v286_v21 = vadd.f32 %v285_v19, %v220_v13  ;;  %v277_v26 = vadd.f32 %v276_v24, %v205_v20 }
 0x14a   :  { %397 = vtanh.f32 %v286_v21 }
 0x14b   :  { %399 = vtanh.f32 %v283_v22 }
 0x14c   :  { %401 = vtanh.f32 %v280_v25 }
 0x14d   :  { %403 = vtanh.f32 %v277_v26 }
 0x14e   :  { %405 = vtanh.f32 %v274_v27 }
 0x14f   :  { %407 = vtanh.f32 %v271_v31 }
 0x150   :  { %v398_v30 = vpop.eup %397  ;;  %409 = vtanh.f32 %v268_v34 }
 0x151   :  { %314 = vmatpush.msra.mxu1 %v398_v30  ;;  %v400_v33 = vpop.eup %399  ;;  %411 = vtanh.f32 %v265_v37 }
 0x152   :  { %v402_v36 = vpop.eup %401 }
 0x153   :  { %315 = vmatpush.msra.mxu1 %v400_v33  ;;  %v404_v38 = vpop.eup %403 }
 0x154   :  { %v406_v39 = vpop.eup %405 }
 0x155   :  { %316 = vmatpush.msra.mxu1 %v402_v36  ;;  %v408_v40 = vpop.eup %407 }
 0x156   :  { %v410_v41 = vpop.eup %409 }
 0x157   :  { %317 = vmatpush.msra.mxu1 %v404_v38  ;;  %v412_v43 = vpop.eup %411 }
 0x159   :  { %318 = vmatpush.msra.mxu1 %v406_v39 }
 0x15b   :  { %319 = vmatpush.msra.mxu1 %v408_v40 }
 0x15d   :  { %320 = vmatpush.msra.mxu1 %v410_v41 }
 0x15f   :  { %321 = vmatpush.msra.mxu1 %v412_v43 }
 0x160   :  { %354 = vmatmul.msk.f32.vlgmr.msra.gmra.mxu1 %vm222_vm0, %v296_v42 }
 0x1dd   :  { %v323_v45 = vpop.f32.mrf.mxu1 }
 0x1de   :  { %v324_v46 = vadd.f32 %v323_v45, %v301_v44 }
 0x1e0   :  { %327 = vst.msk [vmem:[#allocation7] sm:$0x3] %vm326_vm1, %v324_v46 }
 0x1e1   :  { %338 = dma.vmem_to_hbm [thread:$0]  %s334_s1, 32, %s336_s23, [#allocation4]  }
 0x1e2   :  { %489 = dma.done.wait [#allocation4], 32  }
 0x1e3   :  { %490 = vsyncadd [#allocation4], 4294967264 }
 0x1e4   :  { %343 = vsyncpa [#allocation3], 1 }
 0x1e5   :  { %344 = vsyncpa [#allocation6], 1 }
 0x1e6   :  { %345 = vsyncpa [#allocation4], 1 }

</bundles_post_ra>
